<compile_context>
chip_gen: v5e
topology: v5e:2x2
jax: 0.10.0
libtpu: 0.0.40
codegen_flags: <defaults>
</compile_context>

<pallas_src>
import functools

import jax
import jax.numpy as jnp
from jax.experimental import pallas as pl
from jax.experimental.pallas import tpu as pltpu


# ---------------------------------------------------------------------------
# Fused kernel: relu(bn2(conv2(relu(bn1(conv1(x))))) + bn3(conv3(x)))
#   x_ref   : (Cin,  Lin )  bf16   flattened zero-padded input (+KW-1 tail)
#   w13_ref : (2C,   9Cin)  bf16   rows 0..C-1: conv1*s1 ; rows C..2C-1: conv3*s3
#                                  (conv3 occupies only the centre-tap columns)
#   b13_ref : (2C, 1)       f32    [b1 ; b3]
#   w2_ref  : (C, 9C)       bf16   conv2*s2
#   b2_ref  : (C, 1)        f32
#   o_ref   : (C, Lout)     f32    final output over the padded width (crop host-side)
# ---------------------------------------------------------------------------
def _basic_block_kernel(x_ref, w13_ref, b13_ref, w2_ref, b2_ref, o_ref,
                        *, cout, wp, wo, lout):
    offs = [dy * wp + dx for dy in range(3) for dx in range(3)]   # static taps

    # ---- conv1 (3x3) + conv3 (1x1, centre tap) in ONE MXU matmul -----------
    xv = x_ref[...]                                               # (Cin, Lin) bf16
    xt1 = jnp.concatenate([xv[:, o:o + lout] for o in offs], axis=0)  # (9Cin, Lout)
    r13 = jnp.dot(w13_ref[...], xt1,
                  preferred_element_type=jnp.float32)             # (2C, Lout) f32
    r13 = r13 + b13_ref[...]
    out1 = jnp.maximum(r13[:cout, :], 0.0)                        # relu(bn1(conv1(x)))
    iden = r13[cout:, :]                                          # bn3(conv3(x)), f32

    # Zero the (KW-1) garbage columns per row, then embed at flat offset wp+1:
    # this IS conv2's zero-padded, flattened input (the garbage columns sit
    # exactly where the padding ring must be zero).
    col = jax.lax.broadcasted_iota(jnp.int32, (1, lout), 1) % wp
    out1 = jnp.where(col < wo, out1, 0.0).astype(jnp.bfloat16)    # (C, Lout) bf16
    zring = jnp.zeros((cout, wp + 1), jnp.bfloat16)
    mid = jnp.concatenate([zring, out1, zring], axis=1)           # (C, Lin) bf16

    # ---- conv2 (3x3) + bn2 + residual + ReLU, again one matmul -------------
    xt2 = jnp.concatenate([mid[:, o:o + lout] for o in offs], axis=0)  # (9C, Lout)
    r2 = jnp.dot(w2_ref[...], xt2, preferred_element_type=jnp.float32)  # (C, Lout)
    r2 = r2 + b2_ref[...] + iden
    o_ref[...] = jnp.maximum(r2, 0.0).astype(o_ref.dtype)         # lane-dense store


# ---------------------------------------------------------------------------
# BasicBlock forward (NCHW in / NCHW out, matching the PyTorch module)
# ---------------------------------------------------------------------------
def basic_block_forward(params, x_nchw):
    N, Cin, H, W = x_nchw.shape
    KH = KW = 3
    pad = 1
    Hp, Wp = H + 2 * pad, W + 2 * pad
    Lout = H * Wp                         # computed over the padded width
    extra = KW - 1                        # tail so the last tap stays in bounds
    Lin = Hp * Wp + extra
    Cout = params["w1"].shape[-1]

    # ---- pack weights (tiny arrays; BN scale folded in f32, then bf16) -----
    def pack3x3(w, s):                    # (3,3,ci,co) -> (co, 9*ci), scale folded
        co = w.shape[-1]
        return jnp.transpose(w, (3, 0, 1, 2)).reshape(co, -1) * s[:, None]

    w1p = pack3x3(params["w1"], params["s1"])                       # (C, 9*Cin)
    w3p = jnp.zeros((Cout, KH * KW * Cin), jnp.float32)
    w3p = w3p.at[:, 4 * Cin:5 * Cin].set(                           # centre tap only
        params["w3"][0, 0].T * params["s3"][:, None])
    w13 = jnp.concatenate([w1p, w3p], axis=0).astype(jnp.bfloat16)  # (2C, 9*Cin)
    b13 = jnp.concatenate([params["b1"], params["b3"]]
                          ).reshape(2 * Cout, 1).astype(jnp.float32)
    w2p = pack3x3(params["w2"], params["s2"]).astype(jnp.bfloat16)  # (C, 9*C)
    b2 = params["b2"].reshape(Cout, 1).astype(jnp.float32)

    # ---- input: NCHW -> channels on sublanes, flattened padded spatial on lanes
    xb = x_nchw.astype(jnp.bfloat16)
    xp = jnp.pad(xb, ((0, 0), (0, 0), (pad, pad), (pad, pad)))
    xf = jnp.pad(xp.reshape(N, Cin, Hp * Wp), ((0, 0), (0, 0), (0, extra)))

    out = pl.pallas_call(
        functools.partial(_basic_block_kernel,
                          cout=Cout, wp=Wp, wo=W, lout=Lout),
        out_shape=jax.ShapeDtypeStruct((N, Cout, Lout), jnp.float32),
        grid=(N,),
        in_specs=[
            pl.BlockSpec((None, Cin, Lin), lambda n: (n, 0, 0)),
            pl.BlockSpec((2 * Cout, KH * KW * Cin), lambda n: (0, 0)),
            pl.BlockSpec((2 * Cout, 1), lambda n: (0, 0)),
            pl.BlockSpec((Cout, KH * KW * Cout), lambda n: (0, 0)),
            pl.BlockSpec((Cout, 1), lambda n: (0, 0)),
        ],
        out_specs=pl.BlockSpec((None, Cout, Lout), lambda n: (n, 0, 0)),
        compiler_params=pltpu.CompilerParams(
            dimension_semantics=("parallel",)),
    )(xf, w13, b13, w2p, b2)

    # (N, C, H, Wp) -> crop the padded-width garbage columns => NCHW output.
    return out.reshape(N, Cout, H, Wp)[:, :, :, :W]


# ---------------------------------------------------------------------------
# Parameters (deterministic synthetic; BN folded in inference mode)
# ---------------------------------------------------------------------------
def _bn_affine(key, c, eps=1e-5):
    k1, k2, k3, k4 = jax.random.split(key, 4)
    gamma = 1.0 + 0.1 * jax.random.normal(k1, (c,), jnp.float32)
    beta = 0.1 * jax.random.normal(k2, (c,), jnp.float32)
    mean = 0.1 * jax.random.normal(k3, (c,), jnp.float32)
    var = 1.0 + 0.1 * jax.random.uniform(k4, (c,), jnp.float32)
    scale = gamma * jax.lax.rsqrt(var + eps)
    return scale, beta - mean * scale


def init_params(key, in_c, out_c):
    ks = jax.random.split(key, 6)

    def conv_w(k, kh, kw, cin, cout):
        fan_in = kh * kw * cin
        return jax.random.normal(k, (kh, kw, cin, cout), jnp.float32) * (
            (2.0 / fan_in) ** 0.5)

    s1, b1 = _bn_affine(ks[3], out_c)
    s2, b2 = _bn_affine(ks[4], out_c)
    s3, b3 = _bn_affine(ks[5], out_c)
    return dict(w1=conv_w(ks[0], 3, 3, in_c, out_c), s1=s1, b1=b1,
                w2=conv_w(ks[1], 3, 3, out_c, out_c), s2=s2, b2=b2,
                w3=conv_w(ks[2], 1, 1, in_c, out_c), s3=s3, b3=b3)


# ---------------------------------------------------------------------------
# Pure-JAX reference (same folded-scale + bf16 operand rounding as the kernel)
# ---------------------------------------------------------------------------
def _ref_conv_bn(x, w, scale, bias, padding):
    wf = (w * scale[None, None, None, :]).astype(jnp.bfloat16).astype(jnp.float32)
    xb = x.astype(jnp.bfloat16).astype(jnp.float32)
    y = jax.lax.conv_general_dilated(
        xb, wf, window_strides=(1, 1),
        padding=((padding, padding), (padding, padding)),
        dimension_numbers=("NCHW", "HWIO", "NCHW"),
        precision=jax.lax.Precision.HIGHEST)
    return y + bias[None, :, None, None]


def basic_block_ref(params, x):
    iden = _ref_conv_bn(x, params["w3"], params["s3"], params["b3"], 0)
    out = jnp.maximum(
        _ref_conv_bn(x, params["w1"], params["s1"], params["b1"], 1), 0.0)
    out = _ref_conv_bn(out, params["w2"], params["s2"], params["b2"], 1)
    return jnp.maximum(out + iden, 0.0)


if __name__ == "__main__":
    key = jax.random.PRNGKey(0)
    kp, kx = jax.random.split(key)
    in_c, out_c = 4, 8
    params = init_params(kp, in_c, out_c)
    x = jax.random.normal(kx, (2, in_c, 16, 16), jnp.float32)

    fwd = jax.jit(basic_block_forward)
    y = jax.block_until_ready(fwd(params, x))

    assert y.shape == (2, out_c, 16, 16), y.shape
    assert y.dtype == jnp.float32
    assert bool(jnp.all(jnp.isfinite(y)))

    y_ref = basic_block_ref(params, x)
    err = float(jnp.max(jnp.abs(y - y_ref)))
    assert err < 2e-2, err

    print("KERNEL_OK")
</pallas_src>

<mosaic_0001>
module attributes {stable_mosaic.version = 11 : i64} {
  func.func @_basic_block_kernel(%arg0: i32, %arg1: memref<1x4x326xbf16, #tpu.memory_space<vmem>>, %arg2: memref<16x36xbf16, #tpu.memory_space<vmem>>, %arg3: memref<16x1xf32, #tpu.memory_space<vmem>>, %arg4: memref<8x72xbf16, #tpu.memory_space<vmem>>, %arg5: memref<8x1xf32, #tpu.memory_space<vmem>>, %arg6: memref<1x8x288xf32, #tpu.memory_space<vmem>>) attributes {dimension_semantics = [#tpu.dimension_semantics<parallel>], iteration_bounds = array<i64: 2>, scalar_prefetch = 0 : i64, scratch_operands = 0 : i64, tpu.core_type = #tpu.core_type<tc>, window_params = [{transform_indices = @transform_0, window_bounds = array<i64: 1, 4, 326>}, {pipeline_mode = #tpu.pipeline_mode<synchronous>, transform_indices = @transform_1, window_bounds = array<i64: 16, 36>}, {pipeline_mode = #tpu.pipeline_mode<synchronous>, transform_indices = @transform_2, window_bounds = array<i64: 16, 1>}, {pipeline_mode = #tpu.pipeline_mode<synchronous>, transform_indices = @transform_3, window_bounds = array<i64: 8, 72>}, {pipeline_mode = #tpu.pipeline_mode<synchronous>, transform_indices = @transform_4, window_bounds = array<i64: 8, 1>}, {transform_indices = @transform_5, window_bounds = array<i64: 1, 8, 288>}]} {
    %c0 = arith.constant 0 : index
    %c0_0 = arith.constant 0 : index
    %c0_1 = arith.constant 0 : index
    %0 = vector.load %arg1[%c0, %c0_0, %c0_1] : memref<1x4x326xbf16, #tpu.memory_space<vmem>>, vector<1x4x326xbf16>
    %1 = vector.shape_cast %0 : vector<1x4x326xbf16> to vector<4x326xbf16>
    %2 = vector.extract_strided_slice %1 {offsets = [0, 0], sizes = [4, 288], strides = [1, 1]} : vector<4x326xbf16> to vector<4x288xbf16>
    %3 = vector.extract_strided_slice %1 {offsets = [0, 1], sizes = [4, 288], strides = [1, 1]} : vector<4x326xbf16> to vector<4x288xbf16>
    %4 = vector.extract_strided_slice %1 {offsets = [0, 2], sizes = [4, 288], strides = [1, 1]} : vector<4x326xbf16> to vector<4x288xbf16>
    %5 = vector.extract_strided_slice %1 {offsets = [0, 18], sizes = [4, 288], strides = [1, 1]} : vector<4x326xbf16> to vector<4x288xbf16>
    %6 = vector.extract_strided_slice %1 {offsets = [0, 19], sizes = [4, 288], strides = [1, 1]} : vector<4x326xbf16> to vector<4x288xbf16>
    %7 = vector.extract_strided_slice %1 {offsets = [0, 20], sizes = [4, 288], strides = [1, 1]} : vector<4x326xbf16> to vector<4x288xbf16>
    %8 = vector.extract_strided_slice %1 {offsets = [0, 36], sizes = [4, 288], strides = [1, 1]} : vector<4x326xbf16> to vector<4x288xbf16>
    %9 = vector.extract_strided_slice %1 {offsets = [0, 37], sizes = [4, 288], strides = [1, 1]} : vector<4x326xbf16> to vector<4x288xbf16>
    %10 = vector.extract_strided_slice %1 {offsets = [0, 38], sizes = [4, 288], strides = [1, 1]} : vector<4x326xbf16> to vector<4x288xbf16>
    %11 = tpu.concatenate %2, %3, %4, %5, %6, %7, %8, %9, %10 in 0 : vector<4x288xbf16>, vector<4x288xbf16>, vector<4x288xbf16>, vector<4x288xbf16>, vector<4x288xbf16>, vector<4x288xbf16>, vector<4x288xbf16>, vector<4x288xbf16>, vector<4x288xbf16> -> vector<36x288xbf16>
    %c0_2 = arith.constant 0 : index
    %c0_3 = arith.constant 0 : index
    %12 = vector.load %arg2[%c0_2, %c0_3] : memref<16x36xbf16, #tpu.memory_space<vmem>>, vector<16x36xbf16>
    %cst = arith.constant dense<0.000000e+00> : vector<16x288xf32>
    %13 = tpu.matmul %12, %11, %cst {dimension_numbers = #tpu.dot_dimension_numbers<[1], [0], [0], [1], [0, 0, 1, 1], [], []>} : vector<16x36xbf16>, vector<36x288xbf16>, vector<16x288xf32> -> vector<16x288xf32>
    %c0_4 = arith.constant 0 : index
    %c0_5 = arith.constant 0 : index
    %14 = vector.load %arg3[%c0_4, %c0_5] : memref<16x1xf32, #tpu.memory_space<vmem>>, vector<16x1xf32>
    %15 = vector.broadcast %14 : vector<16x1xf32> to vector<16x288xf32>
    %16 = arith.addf %13, %15 : vector<16x288xf32>
    %17 = vector.extract_strided_slice %16 {offsets = [0, 0], sizes = [8, 288], strides = [1, 1]} : vector<16x288xf32> to vector<8x288xf32>
    %cst_6 = arith.constant 0.000000e+00 : f32
    %18 = vector.broadcast %cst_6 : f32 to vector<8x288xf32>
    %19 = arith.maximumf %17, %18 : vector<8x288xf32>
    %20 = vector.extract_strided_slice %16 {offsets = [8, 0], sizes = [8, 288], strides = [1, 1]} : vector<16x288xf32> to vector<8x288xf32>
    %21 = tpu.iota {dimensions = array<i32: 1>} : vector<1x288xi32>
    %c18_i32 = arith.constant 18 : i32
    %c0_i32 = arith.constant 0 : i32
    %22 = arith.cmpi eq, %c18_i32, %c0_i32 : i32
    %c1_i32 = arith.constant 1 : i32
    %23 = arith.select %22, %c1_i32, %c18_i32 : i32
    %24 = vector.broadcast %23 : i32 to vector<1x288xi32>
    %25 = arith.remsi %21, %24 : vector<1x288xi32>
    %c0_i32_7 = arith.constant 0 : i32
    %26 = vector.broadcast %c0_i32_7 : i32 to vector<1x288xi32>
    %27 = arith.cmpi ne, %25, %26 : vector<1x288xi32>
    %c0_i32_8 = arith.constant 0 : i32
    %28 = vector.broadcast %c0_i32_8 : i32 to vector<1x288xi32>
    %29 = arith.cmpi slt, %25, %28 : vector<1x288xi32>
    %c0_i32_9 = arith.constant 0 : i32
    %30 = arith.cmpi slt, %23, %c0_i32_9 : i32
    %31 = vector.broadcast %30 : i1 to vector<1x288xi1>
    %32 = vector.broadcast %31 : vector<1x288xi1> to vector<1x288xi1>
    %33 = arith.xori %29, %32 : vector<1x288xi1>
    %34 = arith.andi %33, %27 : vector<1x288xi1>
    %35 = vector.broadcast %23 : i32 to vector<1x288xi32>
    %36 = arith.addi %25, %35 : vector<1x288xi32>
    %37 = arith.select %34, %36, %25 : vector<1x288xi1>, vector<1x288xi32>
    %c16_i32 = arith.constant 16 : i32
    %38 = vector.broadcast %c16_i32 : i32 to vector<1x288xi32>
    %39 = arith.cmpi slt, %37, %38 : vector<1x288xi32>
    %cst_10 = arith.constant 0.000000e+00 : f32
    %40 = vector.shape_cast %39 : vector<1x288xi1> to vector<1x288xi1>
    %41 = vector.broadcast %40 : vector<1x288xi1> to vector<8x288xi1>
    %42 = vector.broadcast %cst_10 : f32 to vector<8x288xf32>
    %43 = arith.select %41, %19, %42 : vector<8x288xi1>, vector<8x288xf32>
    %44 = arith.truncf %43 : vector<8x288xf32> to vector<8x288xbf16>
    %cst_11 = arith.constant 0.000000e+00 : bf16
    %45 = vector.broadcast %cst_11 : bf16 to vector<8x19xbf16>
    %46 = tpu.concatenate %45, %44, %45 in 1 : vector<8x19xbf16>, vector<8x288xbf16>, vector<8x19xbf16> -> vector<8x326xbf16>
    %47 = vector.extract_strided_slice %46 {offsets = [0, 0], sizes = [8, 288], strides = [1, 1]} : vector<8x326xbf16> to vector<8x288xbf16>
    %48 = vector.extract_strided_slice %46 {offsets = [0, 1], sizes = [8, 288], strides = [1, 1]} : vector<8x326xbf16> to vector<8x288xbf16>
    %49 = vector.extract_strided_slice %46 {offsets = [0, 2], sizes = [8, 288], strides = [1, 1]} : vector<8x326xbf16> to vector<8x288xbf16>
    %50 = vector.extract_strided_slice %46 {offsets = [0, 18], sizes = [8, 288], strides = [1, 1]} : vector<8x326xbf16> to vector<8x288xbf16>
    %51 = vector.extract_strided_slice %46 {offsets = [0, 19], sizes = [8, 288], strides = [1, 1]} : vector<8x326xbf16> to vector<8x288xbf16>
    %52 = vector.extract_strided_slice %46 {offsets = [0, 20], sizes = [8, 288], strides = [1, 1]} : vector<8x326xbf16> to vector<8x288xbf16>
    %53 = vector.extract_strided_slice %46 {offsets = [0, 36], sizes = [8, 288], strides = [1, 1]} : vector<8x326xbf16> to vector<8x288xbf16>
    %54 = vector.extract_strided_slice %46 {offsets = [0, 37], sizes = [8, 288], strides = [1, 1]} : vector<8x326xbf16> to vector<8x288xbf16>
    %55 = vector.extract_strided_slice %46 {offsets = [0, 38], sizes = [8, 288], strides = [1, 1]} : vector<8x326xbf16> to vector<8x288xbf16>
    %56 = tpu.concatenate %47, %48, %49, %50, %51, %52, %53, %54, %55 in 0 : vector<8x288xbf16>, vector<8x288xbf16>, vector<8x288xbf16>, vector<8x288xbf16>, vector<8x288xbf16>, vector<8x288xbf16>, vector<8x288xbf16>, vector<8x288xbf16>, vector<8x288xbf16> -> vector<72x288xbf16>
    %c0_12 = arith.constant 0 : index
    %c0_13 = arith.constant 0 : index
    %57 = vector.load %arg4[%c0_12, %c0_13] : memref<8x72xbf16, #tpu.memory_space<vmem>>, vector<8x72xbf16>
    %cst_14 = arith.constant dense<0.000000e+00> : vector<8x288xf32>
    %58 = tpu.matmul %57, %56, %cst_14 {dimension_numbers = #tpu.dot_dimension_numbers<[1], [0], [0], [1], [0, 0, 1, 1], [], []>} : vector<8x72xbf16>, vector<72x288xbf16>, vector<8x288xf32> -> vector<8x288xf32>
    %c0_15 = arith.constant 0 : index
    %c0_16 = arith.constant 0 : index
    %59 = vector.load %arg5[%c0_15, %c0_16] : memref<8x1xf32, #tpu.memory_space<vmem>>, vector<8x1xf32>
    %60 = vector.broadcast %59 : vector<8x1xf32> to vector<8x288xf32>
    %61 = arith.addf %58, %60 : vector<8x288xf32>
    %62 = arith.addf %61, %20 : vector<8x288xf32>
    %cst_17 = arith.constant 0.000000e+00 : f32
    %63 = vector.broadcast %cst_17 : f32 to vector<8x288xf32>
    %64 = arith.maximumf %62, %63 : vector<8x288xf32>
    %c0_18 = arith.constant 0 : index
    %c0_19 = arith.constant 0 : index
    %c0_20 = arith.constant 0 : index
    %65 = vector.load %arg6[%c0_18, %c0_19, %c0_20] : memref<1x8x288xf32, #tpu.memory_space<vmem>>, vector<1x8x288xf32>
    %66 = vector.shape_cast %65 : vector<1x8x288xf32> to vector<8x288xf32>
    %67 = vector.shape_cast %64 : vector<8x288xf32> to vector<1x8x288xf32>
    tpu.vector_store %arg6[%c0_18, %c0_19, %c0_20], %67 {strides = array<i32>} : memref<1x8x288xf32, #tpu.memory_space<vmem>>, vector<1x8x288xf32>,
    return
  }
  func.func @transform_0(%arg0: i32) -> (i32, i32, i32) {
    %c0_i32 = arith.constant 0 : i32
    %c0_i32_0 = arith.constant 0 : i32
    %c0_i32_1 = arith.constant 0 : i32
    return %arg0, %c0_i32, %c0_i32_0 : i32, i32, i32
  }
  func.func @transform_1(%arg0: i32) -> (i32, i32) {
    %c0_i32 = arith.constant 0 : i32
    %c0_i32_0 = arith.constant 0 : i32
    %c0_i32_1 = arith.constant 0 : i32
    return %c0_i32, %c0_i32_0 : i32, i32
  }
  func.func @transform_2(%arg0: i32) -> (i32, i32) {
    %c0_i32 = arith.constant 0 : i32
    %c0_i32_0 = arith.constant 0 : i32
    %c0_i32_1 = arith.constant 0 : i32
    return %c0_i32, %c0_i32_0 : i32, i32
  }
  func.func @transform_3(%arg0: i32) -> (i32, i32) {
    %c0_i32 = arith.constant 0 : i32
    %c0_i32_0 = arith.constant 0 : i32
    %c0_i32_1 = arith.constant 0 : i32
    return %c0_i32, %c0_i32_0 : i32, i32
  }
  func.func @transform_4(%arg0: i32) -> (i32, i32) {
    %c0_i32 = arith.constant 0 : i32
    %c0_i32_0 = arith.constant 0 : i32
    %c0_i32_1 = arith.constant 0 : i32
    return %c0_i32, %c0_i32_0 : i32, i32
  }
  func.func @transform_5(%arg0: i32) -> (i32, i32, i32) {
    %c0_i32 = arith.constant 0 : i32
    %c0_i32_0 = arith.constant 0 : i32
    %c0_i32_1 = arith.constant 0 : i32
    return %arg0, %c0_i32, %c0_i32_0 : i32, i32, i32
  }
}

</mosaic_0001>

<bundles_post_ra>
// kernel: basic_block_forward.1
= control target key start
LH: loop header
LB: loop body
LE: loop exit
PB: predicated region body
PF: predicated region fallthrough
CT: control target
= control target key end

     0   :  { %s964_s18 = smov 0   ;;  %s1194_s0 = inlined_call_operand.vmem [shape: bf16[2,4,326], index: 0, kind: input, shape index: {}]   ;;  %s1195_s1 = inlined_call_operand.vmem [shape: bf16[16,36], index: 1, kind: input, shape index: {}]   ;;  %s1196_s2 = inlined_call_operand.vmem [shape: f32[16,1], index: 2, kind: input, shape index: {}]   ;;  %s1197_s3 = inlined_call_operand.vmem [shape: bf16[8,72], index: 3, kind: input, shape index: {}]   ;;  %s1198_s4 = inlined_call_operand.vmem [shape: f32[8,1], index: 4, kind: input, shape index: {}]   ;;  %s1199_s5 = inlined_call_operand.vmem [shape: f32[2,8,288], index: 5, kind: output, shape index: {}]  }
   0x1 LB: > { %s874_s19 = sadd.s32 4294967295, %s922_s18   ;;  %p878_p0 = scmp.ge.s32.totalorder %s922_s18, 1  ;;  %s922_s18 = sphi %s964_s18, %s15_s18  }
   0x2   : > { %p187_p1 = scmp.lt.s32.totalorder %s922_s18, 3 }
   0x4   : > { %p188_p2 = pnand %p878_p0, %p187_p1 }
   0x5   : > { %p215_p3 = scmp.lt.s32.totalorder (!%p188_p2), %s874_s19, 1  ;;  %s924_s24 = smov (!%p188_p2), 127  }
   0x6   : > { %191 = sbr.rel (%p188_p2) target bundleno = 818 (0x332), region = 40  ;;  %s925_s25 = smov (!%p188_p2), 126  }
   0x7   : > { %s926_s26 = smov (!%p188_p2), 110   ;;  %s927_s27 = smov (!%p188_p2), 109  }
   0x8   : > { %s928_s28 = smov (!%p188_p2), 108   ;;  %s929_s29 = smov (!%p188_p2), 92  }
   0x9   : > { %s930_s30 = smov (!%p188_p2), 91   ;;  %s931_s6 = smov (!%p188_p2), 90  }
   0xa   : > { %s933_s11 = smov (!%p188_p2), 19  }
   0xb   : > { %s1213_s19 = smov (!%p215_p3, %s874_s19), 1  ;;  %vm1203_vm0 = vcmask 883712   ;;  %vm296_vm1 = vcmask 891904   ;;  %vm363_vm2 = vcmask 736256   ;;  %vm330_vm3 = vcmask 752640   ;;  %v416_v47 = vld [vmem:[%s1196_s2] sm:$0xff] }
   0xc   : > { %s894_s20 = smul.u32 6, %s1213_s19  ;;  %vm1200_vm4 = vcmask 1039360   ;;  %vm347_vm5 = vcmask 744448   ;;  %vm366_vm6 = vcmask 1041408   ;;  %v932_v50 = vmov 0  }
   0xd   : > { %914 = vset.pattern.permute.xlu0 %v932_v50  ;;  %915 = vset.pattern.permute.xlu2 %v932_v50  ;;  %vm1202_vm7 = vcmask 1031168   ;;  %vm380_vm8 = vcmask 1045504   ;;  %vm373_vm9 = vcmask 1043456   ;;  %vm1201_vm10 = vcmask 900096  }
   0xe   : > { %s219_s23 = scalar_lea.vmem %s1194_s0, %s894_s20  ;;  %vm433_vm11 = vcmask 293888   ;;  %s895_s20 = smul.u32 24, %s1213_s19 }
   0xf   : > { %v226_v0 = vld [vmem:[%s219_s23] sm:$0x3f] }
  0x10   : > { %228 = vst [vmem:[#allocation1] ss:$4 sm:$0xff] %v226_v0  ;;  %s224_s23 = scalar_lea.vmem %s1199_s5, %s895_s20 }
  0x17   : > { %v978_v1 = vld.sshfl [vmem:[#allocation1] sm:$0xff pattern:$0x73625140]  ;;  %v980_v2 = vld.sshfl [vmem:[#allocation1 + $0x8] sm:$0xff pattern:$0x73625140] }
  0x18   : > { %v982_v3 = vld.sshfl [vmem:[#allocation1 + $0x10] sm:$0xff pattern:$0x73625140] }
  0x19   : > { %233 = vst [vmem:[#allocation1 + $0x1] ss:$4 sm:$0xff] %v226_v0 }
  0x20   : > { %v234_v4 = vld.sshfl [vmem:[#allocation1] sm:$0xff pattern:$0x73625140]  ;;  %v236_v5 = vld.sshfl [vmem:[#allocation1 + $0x8] sm:$0xff pattern:$0x73625140] }
  0x21   : > { %v238_v6 = vld.sshfl [vmem:[#allocation1 + $0x10] sm:$0xff pattern:$0x73625140]  ;;  %240 = vrot.lane.b32.xlu1 %v234_v4, %s924_s24  ;;  %242 = vrot.lane.b32.xlu2 %v236_v5, %s924_s24 }
  0x22   : > { %250 = vst [vmem:[#allocation1 + $0x2] ss:$4 sm:$0xff] %v226_v0 }
  0x29   : > { %v253_v7 = vld.sshfl [vmem:[#allocation1 + $0x8] sm:$0xff pattern:$0x73625140]  ;;  %v255_v8 = vld.sshfl [vmem:[#allocation1 + $0x10] sm:$0xff pattern:$0x73625140] }
  0x2a   : > { %259 = vrot.lane.b32.xlu1 %v253_v7, %s925_s25  ;;  %v251_v9 = vld.sshfl [vmem:[#allocation1] sm:$0xff pattern:$0x73625140] }
  0x2b   : > { %267 = vst [vmem:[#allocation1 + $0x3] ss:$4 sm:$0xff] %v226_v0  ;;  %257 = vrot.lane.b32.xlu0 %v251_v9, %s925_s25 }
  0x32   : > { %v268_v10 = vld.sshfl [vmem:[#allocation1] sm:$0xff pattern:$0x73625140]  ;;  %v270_v11 = vld.sshfl [vmem:[#allocation1 + $0x8] sm:$0xff pattern:$0x73625140] }
  0x33   : > { %v272_v12 = vld.sshfl [vmem:[#allocation1 + $0x10] sm:$0xff pattern:$0x73625140]  ;;  %274 = vrot.lane.b32.xlu2 %v268_v10, %s926_s26 }
  0x34   : > { %283 = vst [vmem:[#allocation1] ss:$4 sm:$0xff] %v226_v0 }
  0x3b   : > { %v284_v13 = vld.sshfl [vmem:[#allocation1] sm:$0xff pattern:$0x73625140]  ;;  %v288_v14 = vld.sshfl [vmem:[#allocation1 + $0x10] sm:$0xff pattern:$0x73625140] }
  0x3c   : > { %290 = vrot.lane.b32.xlu1 %v284_v13, %s927_s27  ;;  %v286_v15 = vld.sshfl [vmem:[#allocation1 + $0x8] sm:$0xff pattern:$0x73625140] }
  0x3d   : > { %300 = vst [vmem:[#allocation1 + $0x1] ss:$4 sm:$0xff] %v226_v0 }
  0x44   : > { %292 = vrot.lane.b32.xlu1 %v286_v15, %s927_s27  ;;  %v301_v16 = vld.sshfl [vmem:[#allocation1] sm:$0xff pattern:$0x73625140]  ;;  %v303_v17 = vld.sshfl [vmem:[#allocation1 + $0x8] sm:$0xff pattern:$0x73625140] }
  0x45   : > { %v305_v18 = vld.sshfl [vmem:[#allocation1 + $0x10] sm:$0xff pattern:$0x73625140]  ;;  %307 = vrot.lane.b32.xlu2 %v301_v16, %s928_s28 }
  0x46   : > { %317 = vst [vmem:[#allocation1 + $0x2] ss:$4 sm:$0xff] %v226_v0 }
  0x4d   : > { %v320_v19 = vld.sshfl [vmem:[#allocation1 + $0x8] sm:$0xff pattern:$0x73625140]  ;;  %v318_v20 = vld.sshfl [vmem:[#allocation1] sm:$0xff pattern:$0x73625140]  ;;  %309 = vrot.lane.b32.xlu2 %v303_v17, %s928_s28 }
  0x4e   : > { %326 = vrot.lane.b32.xlu1 %v320_v19, %s929_s29  ;;  %324 = vrot.lane.b32.xlu0 %v318_v20, %s929_s29  ;;  %v322_v21 = vld.sshfl [vmem:[#allocation1 + $0x10] sm:$0xff pattern:$0x73625140] }
  0x4f   : > { %334 = vst [vmem:[#allocation1 + $0x3] ss:$4 sm:$0xff] %v226_v0 }
  0x56   : > { %328 = vrot.lane.b32.xlu1 %v322_v21, %s929_s29  ;;  %v337_v22 = vld.sshfl [vmem:[#allocation1 + $0x8] sm:$0xff pattern:$0x73625140]  ;;  %v339_v23 = vld.sshfl [vmem:[#allocation1 + $0x10] sm:$0xff pattern:$0x73625140] }
  0x57   : > { %343 = vrot.lane.b32.xlu0 %v337_v22, %s930_s30  ;;  %v335_v24 = vld.sshfl [vmem:[#allocation1] sm:$0xff pattern:$0x73625140] }
  0x58   : > { %341 = vrot.lane.b32.xlu2 %v335_v24, %s930_s30  ;;  %350 = vst [vmem:[#allocation1] ss:$4 sm:$0xff] %v226_v0 }
  0x5f   : > { %v355_v25 = vld.sshfl [vmem:[#allocation1 + $0x10] sm:$0xff pattern:$0x73625140]  ;;  %v351_v26 = vld.sshfl [vmem:[#allocation1] sm:$0xff pattern:$0x73625140] }
  0x60   : > { %361 = vrot.lane.b32.xlu1 %v355_v25, %s931_s6  ;;  %357 = vrot.lane.b32.xlu0 %v351_v26, %s931_s6  ;;  %v353_v27 = vld.sshfl [vmem:[#allocation1 + $0x8] sm:$0xff pattern:$0x73625140] }
  0x61   : > { %294 = vrot.lane.b32.xlu2 %v288_v14, %s927_s27 }
  0x68   : > { %261 = vrot.lane.b32.xlu1 %v255_v8, %s925_s25  ;;  %359 = vrot.lane.b32.xlu0 %v353_v27, %s931_s6 }
  0x69   : > { %345 = vrot.lane.b32.xlu2 %v339_v23, %s930_s30 }
  0x70   : > { %276 = vrot.lane.b32.xlu0 %v270_v11, %s926_s26 }
  0x71   : > { %278 = vrot.lane.b32.xlu2 %v272_v12, %s926_s26 }
  0x78   : > { %311 = vrot.lane.b32.xlu0 %v305_v18, %s928_s28 }
  0x7b   : > { %v1010_v30 = vpop.permute.xlu2 %242 }
  0x80   : > { %244 = vrot.lane.b32.xlu0 %v238_v6, %s924_s24 }
  0x88   : > { %420 = vperm.xlu0 %914, %v416_v47  }
  0x8d   : > { %v275_v33 = vpop.permute.xlu2 %274 }
  0x93   : > { %v241_v28 = vpop.permute.xlu1 %240 }
  0x94   : > { %v247_v55 = vsel %vm1200_vm4, %v241_v28, %v1010_v30 }
  0x95   : > { %v368_v58 = vsel %vm366_vm6, %v978_v1, %v247_v55  ;;  %v893_v1 = vld [vmem:[%s1195_s1] sm:$0xff] }
  0x9c   : > { %v1008_v29 = vpop.permute.xlu1 %259 }
  0x9d   : > { %v258_v32 = vpop.permute.xlu0 %257 }
  0x9e   : > { %v264_v59 = vsel %vm1202_vm7, %v258_v32, %v1008_v29 }
  0x9f   : > { %v308_v36 = vpop.permute.xlu2 %307  ;;  %v375_v0 = vsel %vm373_vm9, %v368_v58, %v264_v59 }
  0xa7   : > { %v310_v39 = vpop.permute.xlu2 %309 }
  0xa8   : > { %v314_v43 = vsel %vm1203_vm0, %v308_v36, %v310_v39 }
  0xae   : > { %v291_v31 = vpop.permute.xlu1 %290 }
  0xb2   : > { %v342_v42 = vpop.permute.xlu2 %341 }
  0xb6   : > { %v293_v34 = vpop.permute.xlu1 %292 }
  0xb7   : > { %v297_v44 = vsel %vm296_vm1, %v291_v31, %v293_v34 }
  0xb8   : > { %v392_v51 = vsel %vm366_vm6, %v297_v44, %v314_v43 }
  0xbb   : > { %v295_v60 = vpop.permute.xlu2 %294 }
  0xbc   : > { %v298_v8 = vsel %vm296_vm1, %v293_v34, %v295_v60 }
  0xc0   : > { %v325_v35 = vpop.permute.xlu0 %324  ;;  %v327_v37 = vpop.permute.xlu1 %326 }
  0xc1   : > { %v331_v52 = vsel %vm330_vm3, %v325_v35, %v327_v37 }
  0xc2   : > { %v400_v57 = vsel %vm373_vm9, %v392_v51, %v331_v52 }
  0xc3   : > { %v346_v6 = vpop.permute.xlu2 %345 }
  0xc8   : > { %v329_v40 = vpop.permute.xlu1 %328 }
  0xc9   : > { %v344_v38 = vpop.permute.xlu0 %343  ;;  %v332_v11 = vsel %vm330_vm3, %v327_v37, %v329_v40 }
  0xca   : > { %v348_v56 = vsel %vm347_vm5, %v342_v42, %v344_v38  ;;  %v349_v14 = vsel %vm347_vm5, %v344_v38, %v346_v6 }
  0xcb   : > { %v406_v61 = vsel %vm380_vm8, %v400_v57, %v348_v56  ;;  %v279_v19 = vpop.permute.xlu2 %278 }
  0xd2   : > { %v358_v41 = vpop.permute.xlu0 %357  ;;  %v362_v45 = vpop.permute.xlu1 %361 }
  0xd3   : > { %v444_v4 = vsel %vm366_vm6, %v362_v45, 0 }
  0xda   : > { %v360_v46 = vpop.permute.xlu0 %359  ;;  %v262_v18 = vpop.permute.xlu1 %261 }
  0xdb   : > { %v364_v48 = vsel %vm363_vm2, %v358_v41, %v360_v46  ;;  %v365_v49 = vsel %vm363_vm2, %v360_v46, %v362_v45  ;;  %v265_v23 = vsel %vm1202_vm7, %v1008_v29, %v262_v18 }
  0xdc   : > { %v438_v53 = vsel %vm366_vm6, %v364_v48, 0  ;;  %v441_v54 = vsel %vm366_vm6, %v365_v49, 0 }
  0xdd   : > { %451 = vmatpush.bf16.msra.mxu2 %v438_v53  ;;  %465 = vmatpush.bf16.msra.mxu1 %v441_v54 }
  0xe1   : > { %452 = vmatpush.bf16.msra.mxu2 %v406_v61 }
  0xe2   : > { %v277_v62 = vpop.permute.xlu0 %276 }
  0xe3   : > { %v281_v63 = vsel %vm1201_vm10, %v275_v33, %v277_v62  ;;  %v282_v26 = vsel %vm1201_vm10, %v277_v62, %v279_v19 }
  0xe4   : > { %v382_v5 = vsel %vm380_vm8, %v375_v0, %v281_v63 }
  0xe5   : > { %453 = vmatpush.bf16.msra.mxu2 %v382_v5 }
  0xe8   : > { %885 = vmatmul.msk.bf16.vlgmr.msra.gmra.mxu2 %vm433_vm11, %v893_v1 }
  0xe9   : > { %479 = vmatpush.bf16.msrb.mxu2 %v444_v4 }
  0xea   : > { %v312_v7 = vpop.permute.xlu0 %311 }
  0xeb   : > { %v315_v9 = vsel %vm1203_vm0, %v310_v39, %v312_v7  ;;  %v398_v10 = vsel %vm366_vm6, %v295_v60, %v312_v7 }
  0xec   : > { %v395_v12 = vsel %vm366_vm6, %v298_v8, %v315_v9  ;;  %v404_v13 = vsel %vm373_vm9, %v398_v10, %v329_v40 }
  0xed   : > { %v412_v15 = vsel %vm380_vm8, %v404_v13, %v346_v6  ;;  %v402_v16 = vsel %vm373_vm9, %v395_v12, %v332_v11 }
  0xee   : > { %480 = vmatpush.bf16.msrb.mxu2 %v412_v15  ;;  %v409_v17 = vsel %vm380_vm8, %v402_v16, %v349_v14 }
  0xef   : > { %466 = vmatpush.bf16.msra.mxu1 %v409_v17 }
  0xf2   : > { %v245_v20 = vpop.permute.xlu0 %244 }
  0xf3   : > { %v248_v21 = vsel %vm1200_vm4, %v1010_v30, %v245_v20  ;;  %v372_v22 = vsel %vm366_vm6, %v982_v3, %v245_v20  ;;  %v491_v3 = vlaneseq }
  0xf4   : > { %v370_v24 = vsel %vm366_vm6, %v980_v2, %v248_v21  ;;  %v379_v25 = vsel %vm373_vm9, %v372_v22, %v262_v18 }
  0xf5   : > { %v388_v27 = vsel %vm380_vm8, %v379_v25, %v279_v19  ;;  %v377_v28 = vsel %vm373_vm9, %v370_v24, %v265_v23  ;;  %v1067_v29 = vand.u32 127, %v491_v3 }
  0xf6   : > { %481 = vmatpush.bf16.msrb.mxu2 %v388_v27  ;;  %v385_v30 = vsel %vm380_vm8, %v377_v28, %v282_v26 }
  0xf7   : > { %467 = vmatpush.bf16.msra.mxu1 %v385_v30  ;;  %v1070_v2 = vadd.s32 128, %v1067_v29  ;;  %v498_v31 = vand.u32 65535, %v1067_v29  ;;  %v499_v33 = vshrl.u32 %v1067_v29, 16  ;;  %v1076_v35 = vadd.s32 256, %v1067_v29 }
  0xf9   : > { %887 = vmatmul.msk.bf16.vlgmr.msrb.gmra.mxu2 %vm433_vm11, %v893_v1  ;;  %v527_v32 = vand.u32 65535, %v1070_v2  ;;  %v502_v34 = vmul.u32 58254, %v498_v31  ;;  %v528_v36 = vshrl.u32 %v1070_v2, 16  ;;  %v501_v38 = vmul.u32 14564, %v498_v31 }
  0xfa   : > { %886 = vmatmul.msk.bf16.vlgmr.msra.gmra.mxu1 %vm433_vm11, %v893_v1  ;;  %v503_v39 = vmul.u32 14564, %v499_v33  ;;  %v556_v41 = vand.u32 65535, %v1076_v35  ;;  %v557_v45 = vshrl.u32 %v1076_v35, 16  ;;  %v504_v49 = vmul.u32 58254, %v499_v33  ;;  %v421_v3 = vpop.permute.xlu0 %420 }
  0xfb   : > { %v531_v37 = vmul.u32 58254, %v527_v32  ;;  %v505_v40 = vshll.u32 %v502_v34, 16  ;;  %v530_v42 = vmul.u32 14564, %v527_v32  ;;  %v532_v43 = vmul.u32 14564, %v528_v36 }
  0xfc   : > { %v507_v46 = vshll.u32 %v503_v39, 16  ;;  %v560_v48 = vmul.u32 58254, %v556_v41  ;;  %v559_v54 = vmul.u32 14564, %v556_v41  ;;  %v561_v55 = vmul.u32 14564, %v557_v45 }
  0xfd   : > { %v534_v44 = vshll.u32 %v531_v37, 16  ;;  %vm509_vm12 = vc.u32 %v501_v38, %v505_v40  ;;  %v511_v47 = vadd.s32 %v505_v40, %v501_v38  ;;  %v536_v51 = vshll.u32 %v532_v43, 16 }
  0xfe   : > { %v510_v53 = vsel %vm509_vm12, 1, %v932_v50  ;;  %v563_v56 = vshll.u32 %v560_v48, 16  ;;  %v533_v57 = vmul.u32 58254, %v528_v36  ;;  %v565_v61 = vshll.u32 %v561_v55, 16 }
  0xff   : > { %vm538_vm13 = vc.u32 %v530_v42, %v534_v44  ;;  %v540_v52 = vadd.s32 %v534_v44, %v530_v42  ;;  %vm513_vm14 = vc.u32 %v511_v47, %v507_v46  ;;  %v512_v59 = vadd.s32 %v510_v53, %v504_v49 }
 0x100   : > { %v539_v58 = vsel %vm538_vm13, 1, %v932_v50  ;;  %v514_v60 = vsel %vm513_vm14, 1, %v932_v50  ;;  %vm567_vm6 = vc.u32 %v559_v54, %v563_v56  ;;  %v569_v62 = vadd.s32 %v563_v56, %v559_v54 }
 0x101   : > { %vm542_vm15 = vc.u32 %v540_v52, %v536_v51  ;;  %v541_v63 = vadd.s32 %v539_v58, %v533_v57  ;;  %v562_v4 = vmul.u32 58254, %v557_v45  ;;  %v506_v5 = vshrl.u32 %v502_v34, 16 }
 0x102   : > { %v543_v0 = vsel %vm542_vm15, 1, %v932_v50  ;;  %v516_v1 = vadd.s32 %v514_v60, %v512_v59  ;;  %v568_v6 = vsel %vm567_vm6, 1, %v932_v50  ;;  %vm571_vm8 = vc.u32 %v569_v62, %v565_v61 }
 0x103   : > { %v535_v7 = vshrl.u32 %v531_v37, 16  ;;  %v545_v8 = vadd.s32 %v543_v0, %v541_v63  ;;  %v570_v9 = vadd.s32 %v568_v6, %v562_v4  ;;  %v508_v10 = vshrl.u32 %v503_v39, 16  ;;  %v751_v6 = vld [vmem:[%s1198_s4] sm:$0xff] }
 0x104   : > { %v517_v11 = vadd.s32 %v516_v1, %v506_v5  ;;  %v572_v12 = vsel %vm571_vm8, 1, %v932_v50  ;;  %v537_v13 = vshrl.u32 %v532_v43, 16  ;;  %v564_v15 = vshrl.u32 %v560_v48, 16  ;;  %v417_v1 = vld [vmem:[%s1196_s2 + $0x8] sm:$0xff] }
 0x105   : > { %v546_v14 = vadd.s32 %v545_v8, %v535_v7  ;;  %v574_v16 = vadd.s32 %v572_v12, %v570_v9  ;;  %v566_v19 = vshrl.u32 %v561_v55, 16 }
 0x106   : > { %v518_v17 = vadd.s32 %v517_v11, %v508_v10 }
 0x107   : > { %v547_v18 = vadd.s32 %v546_v14, %v537_v13  ;;  %v575_v20 = vadd.s32 %v574_v16, %v564_v15 }
 0x108   : > { %v519_v21 = vshrl.u32 %v518_v17, 4 }
 0x109   : > { %v548_v22 = vshrl.u32 %v547_v18, 4  ;;  %v576_v23 = vadd.s32 %v575_v20, %v566_v19 }
 0x10a   : > { %v520_v24 = vmul.u32 18, %v519_v21 }
 0x10b   : > { %v549_v25 = vmul.u32 18, %v548_v22  ;;  %v577_v26 = vshrl.u32 %v576_v23, 4 }
 0x10c   : > { %v521_v27 = vsub.s32 %v1067_v29, %v520_v24 }
 0x10d   : > { %v550_v30 = vsub.s32 %v1070_v2, %v549_v25  ;;  %v578_v50 = vmul.u32 18, %v577_v26 }
 0x10e   : > { %vm582_vm11 = vcmp.ne.s32.totalorder %v521_v27, 0  ;;  %vm585_vm12 = vcmp.lt.s32.totalorder %v521_v27, 0  ;;  %v591_v31 = vadd.s32 18, %v521_v27 }
 0x10f   : > { %vm583_vm13 = vcmp.ne.s32.totalorder %v550_v30, 0  ;;  %vm586_vm14 = vcmp.lt.s32.totalorder %v550_v30, 0  ;;  %vm588_vm15 = vmand %vm585_vm12, %vm582_vm11  ;;  %v579_v32 = vsub.s32 %v1076_v35, %v578_v50  ;;  %v592_v33 = vadd.s32 18, %v550_v30 }
 0x110   : > { %vm589_vm6 = vmand %vm586_vm14, %vm583_vm13  ;;  %v594_v37 = vsel %vm588_vm15, %v591_v31, %v521_v27 }
 0x111   : > { %vm584_vm8 = vcmp.ne.s32.totalorder %v579_v32, 0  ;;  %vm587_vm4 = vcmp.lt.s32.totalorder %v579_v32, 0  ;;  %v595_v29 = vsel %vm589_vm6, %v592_v33, %v550_v30  ;;  %vm597_vm10 = vcmp.lt.s32.totalorder %v594_v37, 16 }
 0x112   : > { %v593_v39 = vadd.s32 18, %v579_v32  ;;  %vm590_vm7 = vmand %vm587_vm4, %vm584_vm8  ;;  %vm598_vm0 = vcmp.lt.s32.totalorder %v595_v29, 16  ;;  %vm625_vm4 = vcmask 154624  }
 0x114   : > { %v596_v43 = vsel %vm590_vm7, %v593_v39, %v579_v32  ;;  %vm1205_vm7 = vcmask 1031168  }
 0x115   : > { %vm599_vm11 = vcmp.lt.s32.totalorder %v596_v43, 16 }
 0x16b   : > { %v455_v28 = vpop.f32.mrf.mxu2 }
 0x16c   : > { %v456_v34 = vadd.f32 %v455_v28, %v421_v3 }
 0x16e   : > { %v488_v2 = vmax.f32 %v456_v34, 0.0 }
 0x170   : > { %v606_v42 = vsel %vm597_vm10, %v488_v2, 0.0  ;;  %vm1206_vm10 = vcmask 900096  }
 0x171   : > { %vm1210_vm13 = vmmov %vm1206_vm10 }
 0x173   : > { %v1090_v36 = vpop.f32.mrf.mxu2 }
 0x177   : > { %v469_v38 = vpop.f32.mrf.mxu1 }
 0x178   : > { %v470_v40 = vadd.f32 %v469_v38, %v421_v3 }
 0x17a   : > { %v489_v41 = vmax.f32 %v470_v40, 0.0 }
 0x17c   : > { %v607_v35 = vsel %vm598_vm0, %v489_v41, 0.0  ;;  %v483_v44 = vpop.f32.mrf.mxu2  ;;  %vm632_vm0 = vcmask 416768  }
 0x17d   : > { %v484_v45 = vadd.f32 %v483_v44, %v421_v3  ;;  %v609_v46 = vpack.c.bf16 %v607_v35, %v606_v42 }
 0x17f   : > { %v490_v47 = vmax.f32 %v484_v45, 0.0  ;;  %v614_v48 = vunpack.c.h.b16 %v609_v46  ;;  %v613_v49 = vunpack.c.l.b16 %v609_v46 }
 0x181   : > { %v608_v51 = vsel %vm599_vm11, %v490_v47, 0.0  ;;  %v617_v52 = vpack.c.b16 %v614_v48, %v614_v48  ;;  %v616_v53 = vpack.c.b16 %v613_v49, %v613_v49 }
 0x182   : > { %v610_v54 = vpack.c.bf16 %v608_v51, %v608_v51  ;;  %v750_v51 = vld [vmem:[%s1197_s3] sm:$0xf] }
 0x183   : > { %621 = vrot.lane.b32.xlu2 %v617_v52, %s933_s11  ;;  %619 = vrot.lane.b32.xlu1 %v616_v53, %s933_s11 }
 0x184   : > { %v615_v55 = vunpack.c.l.b16 %v610_v54 }
 0x186   : > { %v618_v56 = vpack.c.b16 %v615_v55, %v615_v55 }
 0x18b   : > { %623 = vrot.lane.b32.xlu1 %v618_v56, %s933_s11 }
 0x1dd   : > { %v622_v57 = vpop.permute.xlu2 %621 }
 0x1f5   : > { %v620_v58 = vpop.permute.xlu1 %619 }
 0x1f6   : > { %v1093_v59 = vsel %vm625_vm4, %v620_v58, %v622_v57  ;;  %v1096_v60 = vsel %vm625_vm4, 0, %v620_v58 }
 0x1f7   : > { %680 = vrot.lane.b32.xlu1 %v1096_v60, %s929_s29  ;;  %696 = vrot.lane.b32.xlu2 %v1096_v60, %s931_s6  ;;  %v637_v61 = vrot.slane %v1096_v60, 4  ;;  %v638_v62 = vrot.slane %v1093_v59, 4 }
 0x1f8   : > { %698 = vrot.lane.b32.xlu0 %v1093_v59, %s931_s6 }
 0x1fd   : > { %v624_v63 = vpop.permute.xlu1 %623 }
 0x1fe   : > { %v627_v0 = vsel %vm625_vm4, %v622_v57, %v624_v63  ;;  %v471_v63 = vpop.f32.mrf.mxu1 }
 0x1ff   : > { %666 = vrot.lane.b32.xlu1 %v1093_v59, %s927_s27  ;;  %682 = vrot.lane.b32.xlu2 %v1093_v59, %s929_s29  ;;  %v1121_v4 = vsel %vm632_vm0, %v627_v0, 0 }
 0x200   : > { %664 = vrot.lane.b32.xlu0 %v1096_v60, %s927_s27  ;;  %v639_v5 = vrot.slane %v1121_v4, 4 }
 0x207   : > { %650 = vrot.lane.b32.xlu1 %v1093_v59, %s925_s25  ;;  %672 = vrot.lane.b32.xlu2 %v637_v61, %s928_s28 }
 0x208   : > { %648 = vrot.lane.b32.xlu0 %v1096_v60, %s925_s25 }
 0x20f   : > { %656 = vrot.lane.b32.xlu2 %v637_v61, %s926_s26  ;;  %690 = vrot.lane.b32.xlu1 %v638_v62, %s930_s30 }
 0x210   : > { %688 = vrot.lane.b32.xlu0 %v637_v61, %s930_s30 }
 0x217   : > { %642 = vrot.lane.b32.xlu1 %v638_v62, %s924_s24  ;;  %700 = vrot.lane.b32.xlu2 %v1121_v4, %s931_s6 }
 0x218   : > { %674 = vrot.lane.b32.xlu0 %v638_v62, %s928_s28 }
 0x21f   : > { %684 = vrot.lane.b32.xlu1 %v1121_v4, %s929_s29  ;;  %692 = vrot.lane.b32.xlu2 %v639_v5, %s930_s30 }
 0x220   : > { %658 = vrot.lane.b32.xlu0 %v638_v62, %s926_s26 }
 0x227   : > { %668 = vrot.lane.b32.xlu1 %v1121_v4, %s927_s27  ;;  %676 = vrot.lane.b32.xlu2 %v639_v5, %s928_s28 }
 0x228   : > { %640 = vrot.lane.b32.xlu0 %v637_v61, %s924_s24 }
 0x22f   : > { %644 = vrot.lane.b32.xlu1 %v639_v5, %s924_s24  ;;  %652 = vrot.lane.b32.xlu2 %v1121_v4, %s925_s25 }
 0x230   : > { %660 = vrot.lane.b32.xlu0 %v639_v5, %s926_s26 }
 0x237   : > { %425 = vperm.xlu2 %915, %v417_v1  }
 0x238   : > { %754 = vperm.xlu0 %914, %v751_v6  }
 0x251   : > { %v697_v7 = vpop.permute.xlu2 %696 }
 0x259   : > { %v683_v8 = vpop.permute.xlu2 %682 }
 0x261   : > { %v673_v9 = vpop.permute.xlu2 %672 }
 0x269   : > { %v657_v10 = vpop.permute.xlu2 %656  ;;  %v681_v11 = vpop.permute.xlu1 %680 }
 0x26a   : > { %v699_v12 = vpop.permute.xlu0 %698  ;;  %v686_v25 = vsel %vm330_vm3, %v681_v11, %v683_v8 }
 0x26b   : > { %v702_v13 = vsel %vm363_vm2, %v697_v7, %v699_v12 }
 0x26c   : > { %v762_v14 = vsel %vm373_vm9, %v702_v13, 0 }
 0x26d   : > { %773 = vmatpush.bf16.msra.mxu3 %v762_v14 }
 0x271   : > { %v701_v15 = vpop.permute.xlu2 %700  ;;  %v667_v16 = vpop.permute.xlu1 %666 }
 0x272   : > { %v665_v17 = vpop.permute.xlu0 %664  ;;  %v768_v18 = vsel %vm373_vm9, %v701_v15, 0  ;;  %v703_v19 = vsel %vm363_vm2, %v699_v12, %v701_v15  ;;  %vm1204_vm2 = vcmask 883712  }
 0x273   : > { %799 = vmatpush.bf16.msrb.mxu1 %v768_v18  ;;  %v765_v20 = vsel %vm373_vm9, %v703_v19, 0  ;;  %v670_v50 = vsel %vm296_vm1, %v665_v17, %v667_v16  ;;  %vm1207_vm12 = vmmov %vm1204_vm2 }
 0x274   : > { %786 = vmatpush.bf16.msra.mxu0 %v765_v20 }
 0x279   : > { %v651_v21 = vpop.permute.xlu1 %650  ;;  %v693_v31 = vpop.permute.xlu2 %692 }
 0x27a   : > { %v649_v22 = vpop.permute.xlu0 %648 }
 0x27b   : > { %v654_v2 = vsel %vm1205_vm7, %v649_v22, %v651_v21 }
 0x281   : > { %v691_v23 = vpop.permute.xlu1 %690  ;;  %v677_v42 = vpop.permute.xlu2 %676 }
 0x282   : > { %v689_v24 = vpop.permute.xlu0 %688  ;;  %v695_v34 = vsel %vm347_vm5, %v691_v23, %v693_v31 }
 0x283   : > { %v694_v26 = vsel %vm347_vm5, %v689_v24, %v691_v23  ;;  %vm757_vm5 = vcmask 588800  }
 0x284   : > { %v740_v27 = vsel %vm373_vm9, %v686_v25, %v694_v26 }
 0x285   : > { %774 = vmatpush.bf16.msra.mxu3 %v740_v27 }
 0x289   : > { %v643_v28 = vpop.permute.xlu1 %642  ;;  %v653_v52 = vpop.permute.xlu2 %652 }
 0x28a   : > { %v675_v30 = vpop.permute.xlu0 %674 }
 0x28b   : > { %v678_v3 = vsel %vm1204_vm2, %v673_v9, %v675_v30  ;;  %v679_v35 = vsel %vm1207_vm12, %v675_v30, %v677_v42 }
 0x28c   : > { %v728_v32 = vsel %vm373_vm9, %v670_v50, %v678_v3 }
 0x28d   : > { %775 = vmatpush.bf16.msra.mxu3 %v728_v32 }
 0x291   : > { %v685_v33 = vpop.permute.xlu1 %684  ;;  %v426_v0 = vpop.permute.xlu2 %425 }
 0x292   : > { %v659_v37 = vpop.permute.xlu0 %658  ;;  %v687_v29 = vsel %vm330_vm3, %v683_v8, %v685_v33  ;;  %v748_v39 = vsel %vm373_vm9, %v685_v33, %v693_v31  ;;  %vm1208_vm3 = vcmask 1039360   ;;  %v458_v6 = vadd.f32 %v1090_v36, %v426_v0 }
 0x293   : > { %v662_v38 = vsel %vm1206_vm10, %v657_v10, %v659_v37  ;;  %v744_v40 = vsel %vm373_vm9, %v687_v29, %v695_v34  ;;  %800 = vmatpush.bf16.msrb.mxu1 %v748_v39  ;;  %vm1211_vm14 = vmmov %vm1208_vm3  ;;  %v472_v13 = vadd.f32 %v471_v63, %v426_v0 }
 0x294   : > { %v716_v41 = vsel %vm373_vm9, %v654_v2, %v662_v38  ;;  %787 = vmatpush.bf16.msra.mxu0 %v744_v40 }
 0x295   : > { %776 = vmatpush.bf16.msra.mxu3 %v716_v41 }
 0x299   : > { %v669_v43 = vpop.permute.xlu1 %668 }
 0x29a   : > { %v641_v44 = vpop.permute.xlu0 %640  ;;  %v671_v45 = vsel %vm296_vm1, %v667_v16, %v669_v43  ;;  %v736_v46 = vsel %vm373_vm9, %v669_v43, %v677_v42  ;;  %vm1209_vm1 = vmmov %vm1205_vm7 }
 0x29b   : > { %v646_v47 = vsel %vm1208_vm3, %v641_v44, %v643_v28  ;;  %801 = vmatpush.bf16.msrb.mxu1 %v736_v46  ;;  %v732_v48 = vsel %vm373_vm9, %v671_v45, %v679_v35  ;;  %v655_v55 = vsel %vm1209_vm1, %v651_v21, %v653_v52 }
 0x29c   : > { %v705_v49 = vsel %vm373_vm9, %v1096_v60, %v646_v47  ;;  %788 = vmatpush.bf16.msra.mxu0 %v732_v48 }
 0x29d   : > { %777 = vmatpush.bf16.msra.mxu3 %v705_v49 }
 0x2a0   : > { %888 = vmatmul.msk.bf16.vlgmr.msra.gmra.mxu3 %vm757_vm5, %v750_v51 }
 0x2a1   : > { %v645_v54 = vpop.permute.xlu1 %644 }
 0x2a2   : > { %v661_v53 = vpop.permute.xlu0 %660  ;;  %v647_v60 = vsel %vm1211_vm14, %v643_v28, %v645_v54  ;;  %v712_v61 = vsel %vm373_vm9, %v1121_v4, %v645_v54  ;;  %v485_v4 = vpop.f32.mrf.mxu2 }
 0x2a3   : > { %v663_v56 = vsel %vm1210_vm13, %v659_v37, %v661_v53  ;;  %v724_v57 = vsel %vm373_vm9, %v653_v52, %v661_v53  ;;  %v709_v62 = vsel %vm373_vm9, %v1093_v59, %v647_v60  ;;  %v486_v10 = vadd.f32 %v485_v4, %v426_v0 }
 0x2a4   : > { %802 = vmatpush.bf16.msrb.mxu1 %v724_v57  ;;  %v720_v58 = vsel %vm373_vm9, %v655_v55, %v663_v56  ;;  %vm817_vm9 = vcmask 261120  }
 0x2a5   : > { %789 = vmatpush.bf16.msra.mxu0 %v720_v58 }
 0x2a8   : > { %803 = vmatpush.bf16.msrb.mxu1 %v712_v61 }
 0x2a9   : > { %790 = vmatpush.bf16.msra.mxu0 %v709_v62 }
 0x2aa   : > { %v755_v5 = vpop.permute.xlu0 %754 }
 0x2ab   : > { %890 = vmatmul.msk.bf16.vlgmr.msrb.gmra.mxu1 %vm757_vm5, %v750_v51 }
 0x2ac   : > { %889 = vmatmul.msk.bf16.vlgmr.msra.gmra.mxu0 %vm757_vm5, %v750_v51 }
 0x323   : > { %v779_v1 = vpop.f32.mrf.mxu3 }
 0x324   : > { %v780_v7 = vadd.f32 %v779_v1, %v755_v5 }
 0x326   : > { %v809_v8 = vadd.f32 %v780_v7, %v458_v6 }
 0x328   : > { %v812_v59 = vmax.f32 %v809_v8, 0.0  ;;  %v805_v9 = vpop.f32.mrf.mxu1 }
 0x329   : > { %v806_v11 = vadd.f32 %v805_v9, %v755_v5  ;;  %v792_v12 = vpop.f32.mrf.mxu0 }
 0x32a   : > { %815 = vst [vmem:[%s224_s23] sm:$0xff] %v812_v59  ;;  %v793_v14 = vadd.f32 %v792_v12, %v755_v5 }
 0x32b   : > { %v811_v15 = vadd.f32 %v806_v11, %v486_v10  ;;  %v781_v16 = vpop.f32.mrf.mxu3 }
 0x32c   : > { %v810_v17 = vadd.f32 %v793_v14, %v472_v13 }
 0x32d   : > { %v814_v36 = vmax.f32 %v811_v15, 0.0 }
 0x32e   : > { %v813_v18 = vmax.f32 %v810_v17, 0.0 }
 0x32f   : > { %818 = vst.msk [vmem:[%s224_s23 + $0x10] sm:$0xff] %vm817_vm9, %v814_v36 }
 0x330   : > { %816 = vst [vmem:[%s224_s23 + $0x8] sm:$0xff] %v813_v18  ;;  %v807_v19 = vpop.f32.mrf.mxu1 }
 0x331   : > { %v794_v20 = vpop.f32.mrf.mxu0 }
 0x332 PF: > { %s15_s18 = sadd.s32 1, %s922_s18  }
 0x333   : > { %p12_p4 = scmp.ge.s32.totalorder %s15_s18, 4  }
 0x335   :  { %14 = sbr.rel (!%p12_p4) target bundleno = 1 (0x1), region = 76 }

</bundles_post_ra>
